<compile_context>
chip_gen: v6e
topology: v6e:2x2x1
jax: 0.10.0
libtpu: 0.0.40
codegen_flags: <defaults>
</compile_context>

<pallas_src>
import functools

import jax
import jax.numpy as jnp
from jax.experimental import pallas as pl
from jax.experimental.pallas import tpu as pltpu


# ---------------------------------------------------------------------------
# kernel
# ---------------------------------------------------------------------------
def net_kernel(x_ref, wcat_ref, bcol_ref, w1_ref, b1_ref, w2_ref, b2_ref, out_ref,
               *, pool_size, fpad):
    # x_ref:    (TB, C)                wcat_ref: (C, pool*Fpad)   bcol_ref: (1, Fpad)
    # w1_ref:   (Fpad, n4)             b1_ref:   (1, n4)
    # w2_ref:   (n4, n_classes)        b2_ref:   (1, n_classes)   out_ref: (TB, n_classes)
    x = x_ref[...]                                                    # (TB, C)

    # conv for ALL pool offsets == one wide MXU matmul
    y = jnp.dot(x, wcat_ref[...], preferred_element_type=jnp.float32)  # (TB, pool*Fpad)

    # max-pool == elementwise max over 128-aligned column slabs (pool_size is tiny, static)
    m = y[:, :fpad]
    for q in range(1, pool_size):
        m = jnp.maximum(m, y[:, q * fpad:(q + 1) * fpad])

    # bias after the max (exact), then tanh. Padded columns: tanh(0 + 0) = 0.
    feat = jnp.tanh(m + bcol_ref[...])                                # (TB, Fpad)

    h = jnp.tanh(jnp.dot(feat, w1_ref[...],
                         preferred_element_type=jnp.float32) + b1_ref[...])   # (TB, n4)
    out_ref[...] = (jnp.dot(h, w2_ref[...],
                            preferred_element_type=jnp.float32) + b2_ref[...])


# ---------------------------------------------------------------------------
# weight preparation (hoist out of the per-step path)
# ---------------------------------------------------------------------------
def prepare_weights(params, *, input_channels, kernel_size, pool_size):
    """Fold conv taps + pool offsets into a banded, 128-padded weight slab.

    Column order inside each pool-offset block is k*P + p (channel-major), matching
    torch's `.view(-1, features_size)` flatten, so pooled/tanh'd features feed FC1
    directly with no relayout.
    """
    wc, bc, w1t, b1, w2t, b2 = params
    K = wc.shape[0]
    C = input_channels
    L = C - kernel_size + 1                      # conv output length
    P = L // pool_size                           # pooled length (floor, like MaxPool1d)
    F = K * P                                    # == torch features_size
    Fpad = ((F + 127) // 128) * 128              # lane-aligned feature width
    n4 = w1t.shape[1]
    n_classes = w2t.shape[1]

    # Banded weights: Wq[c, k*P + p] = wc[k, j]  iff  c == p*pool + q + j.
    c_ix = jnp.arange(C)[:, None, None]
    p_ix = jnp.arange(P)[None, :, None]
    j_ix = jnp.arange(kernel_size)[None, None, :]
    blocks = []
    for q in range(pool_size):
        sel = (c_ix == p_ix * pool_size + q + j_ix).astype(jnp.float32)   # (C, P, ksize)
        wq = jnp.einsum('cpj,kj->ckp', sel, wc.astype(jnp.float32)).reshape(C, F)
        blocks.append(jnp.pad(wq, ((0, 0), (0, Fpad - F))))               # zero-pad cols
    wcat = jnp.concatenate(blocks, axis=1)                                # (C, pool*Fpad)

    bcol = jnp.pad(jnp.repeat(bc.astype(jnp.float32), P),
                   (0, Fpad - F))[None, :]                                # (1, Fpad)
    w1p = jnp.pad(w1t.astype(jnp.float32), ((0, Fpad - F), (0, 0)))       # (Fpad, n4)

    prepped = (wcat, bcol, w1p,
               jnp.asarray(b1, jnp.float32).reshape(1, n4),
               jnp.asarray(w2t, jnp.float32),
               jnp.asarray(b2, jnp.float32).reshape(1, n_classes))
    meta = dict(fpad=Fpad, n4=n4, n_classes=n_classes, C=C)
    return prepped, meta


# ---------------------------------------------------------------------------
# forward
# ---------------------------------------------------------------------------
def net_forward(x4, prepped, meta, *, pool_size, block_b=2048):
    """x4: (B, C, 1, 1) as in the PyTorch module. Returns (B, n_classes)."""
    wcat, bcol, w1p, b1, w2t, b2 = prepped
    fpad = meta["fpad"]
    C = meta["C"]
    n4 = meta["n4"]
    n_classes = meta["n_classes"]
    B = x4.shape[0]

    x = x4[:, :, 0, 0].astype(jnp.float32)       # squeeze(-1).squeeze(-1) -> (B, C)

    # ---- batch tiling -------------------------------------------------------
    # Big tiles amortize per-grid-step overhead, but keep >= 2 tiles when the batch
    # allows it so v7x megacore can shard the ("parallel",) grid across both TCs.
    B8 = ((B + 7) // 8) * 8
    if B8 >= 16:
        tb_cap = ((B8 // 2 + 7) // 8) * 8        # at least 2 tiles
    else:
        tb_cap = B8
    TB = max(8, min(int(block_b), tb_cap))
    TB = ((TB + 7) // 8) * 8
    Bp = ((B + TB - 1) // TB) * TB
    if Bp != B:
        x = jnp.pad(x, ((0, Bp - B), (0, 0)))

    # ---- VMEM budget (generation-aware cap) ---------------------------------
    work_bytes = 4 * (2 * TB * C + 2 * TB * n_classes            # double-buffered I/O tiles
                      + C * pool_size * fpad + fpad * n4 + fpad
                      + n4 + n4 * n_classes + n_classes          # resident weights
                      + TB * (pool_size * fpad + fpad + n4))     # kernel intermediates
    try:
        vmem_cap = int(pltpu.get_tpu_info().vmem_capacity_bytes)
    except Exception:
        vmem_cap = 64 * 1024 * 1024              # conservative (v7x per-TC) fallback
    vmem_ceiling = min(vmem_cap // 2, 64 * 1024 * 1024)
    vmem_limit = int(min(max(2 * work_bytes, 4 * 1024 * 1024), vmem_ceiling))

    kern = functools.partial(net_kernel, pool_size=pool_size, fpad=fpad)
    out = pl.pallas_call(
        kern,
        out_shape=jax.ShapeDtypeStruct((Bp, n_classes), jnp.float32),
        grid=(Bp // TB,),
        in_specs=[
            pl.BlockSpec((TB, C), lambda i: (i, 0)),                      # x tile
            pl.BlockSpec((C, pool_size * fpad), lambda i: (0, 0)),        # fused conv weights
            pl.BlockSpec((1, fpad), lambda i: (0, 0)),                    # conv bias (padded)
            pl.BlockSpec((fpad, n4), lambda i: (0, 0)),                   # fc1 weight (padded rows)
            pl.BlockSpec((1, n4), lambda i: (0, 0)),                      # fc1 bias
            pl.BlockSpec((n4, n_classes), lambda i: (0, 0)),              # fc2 weight
            pl.BlockSpec((1, n_classes), lambda i: (0, 0)),               # fc2 bias
        ],
        out_specs=pl.BlockSpec((TB, n_classes), lambda i: (i, 0)),
        compiler_params=pltpu.CompilerParams(
            dimension_semantics=("parallel",),
            vmem_limit_bytes=vmem_limit),
    )(x, wcat, bcol, w1p, b1, w2t, b2)
    return out[:B]


# ---------------------------------------------------------------------------
# pure-JAX reference mirroring the PyTorch forward exactly
# ---------------------------------------------------------------------------
def ref_forward(x4, params, *, kernel_size, pool_size):
    wc, bc, w1t, b1, w2t, b2 = params
    x = x4[:, :, 0, 0]
    B, C = x.shape
    K = wc.shape[0]
    L = C - kernel_size + 1
    P = L // pool_size
    windows = jnp.stack([x[:, j:j + L] for j in range(kernel_size)], axis=-1)
    conv = jnp.einsum('blj,kj->bkl', windows, wc) + bc[None, :, None]
    pooled = conv[:, :, :P * pool_size].reshape(B, K, P, pool_size).max(-1)
    feat = jnp.tanh(pooled).reshape(B, K * P)
    h = jnp.tanh(feat @ w1t + b1)
    return h @ w2t + b2


if __name__ == "__main__":
    # small shapes consistent with the module
    input_channels = 32
    n_kernels, kernel_size, pool_size = 8, 5, 2
    n4, n_classes = 32, 6
    L = input_channels - kernel_size + 1
    P = L // pool_size
    features_size = n_kernels * P                # == torch _get_final_flattened_size()

    key = jax.random.PRNGKey(0)
    kx, kc, k1, k2, kx2, kx3 = jax.random.split(key, 6)

    # weight_init: uniform(-0.05, 0.05) on weights, zeros on biases
    wc = jax.random.uniform(kc, (n_kernels, kernel_size), jnp.float32, -0.05, 0.05)
    bc = jnp.zeros((n_kernels,), jnp.float32)
    w1t = jax.random.uniform(k1, (n4, features_size), jnp.float32, -0.05, 0.05).T
    b1 = jnp.zeros((1, n4), jnp.float32)
    w2t = jax.random.uniform(k2, (n_classes, n4), jnp.float32, -0.05, 0.05).T
    b2 = jnp.zeros((1, n_classes), jnp.float32)
    params = (wc, bc, w1t, b1, w2t, b2)

    # banded / padded weights computed once (hoisted out of the per-step path)
    prepped, meta = prepare_weights(params, input_channels=input_channels,
                                    kernel_size=kernel_size, pool_size=pool_size)

    # test 1: tiny batch (single 8-row tile, padded)
    B = 4
    x4 = jax.random.normal(kx, (B, input_channels, 1, 1), dtype=jnp.float32)
    out = net_forward(x4, prepped, meta, pool_size=pool_size)
    out = jax.block_until_ready(out)
    ref = ref_forward(x4, params, kernel_size=kernel_size, pool_size=pool_size)
    assert out.shape == (B, n_classes)
    assert jnp.allclose(out, ref, atol=2e-5, rtol=2e-5)

    # test 2: explicit small tile -> exercises a 3-step batch grid (last tile padded)
    B2 = 20
    x4b = jax.random.normal(kx2, (B2, input_channels, 1, 1), dtype=jnp.float32)
    out2 = net_forward(x4b, prepped, meta, pool_size=pool_size, block_b=8)
    out2 = jax.block_until_ready(out2)
    ref2 = ref_forward(x4b, params, kernel_size=kernel_size, pool_size=pool_size)
    assert out2.shape == (B2, n_classes)
    assert jnp.allclose(out2, ref2, atol=2e-5, rtol=2e-5)

    # test 3: default block_b -> auto tile cap gives exactly 2 tiles (megacore path)
    B3 = 64
    x4c = jax.random.normal(kx3, (B3, input_channels, 1, 1), dtype=jnp.float32)
    out3 = net_forward(x4c, prepped, meta, pool_size=pool_size)
    out3 = jax.block_until_ready(out3)
    ref3 = ref_forward(x4c, params, kernel_size=kernel_size, pool_size=pool_size)
    assert out3.shape == (B3, n_classes)
    assert jnp.allclose(out3, ref3, atol=2e-5, rtol=2e-5)

    print("KERNEL_OK")
</pallas_src>

<mosaic_0001>
module attributes {stable_mosaic.version = 11 : i64} {
  func.func @net_kernel(%arg0: i32, %arg1: memref<8x32xf32, #tpu.memory_space<vmem>>, %arg2: memref<32x256xf32, #tpu.memory_space<vmem>>, %arg3: memref<1x128xf32, #tpu.memory_space<vmem>>, %arg4: memref<128x32xf32, #tpu.memory_space<vmem>>, %arg5: memref<1x32xf32, #tpu.memory_space<vmem>>, %arg6: memref<32x6xf32, #tpu.memory_space<vmem>>, %arg7: memref<1x6xf32, #tpu.memory_space<vmem>>, %arg8: memref<8x6xf32, #tpu.memory_space<vmem>>) attributes {dimension_semantics = [#tpu.dimension_semantics<parallel>], iteration_bounds = array<i64: 1>, scalar_prefetch = 0 : i64, scratch_operands = 0 : i64, tpu.core_type = #tpu.core_type<tc>, window_params = [{transform_indices = @transform_0, window_bounds = array<i64: 8, 32>}, {pipeline_mode = #tpu.pipeline_mode<synchronous>, transform_indices = @transform_1, window_bounds = array<i64: 32, 256>}, {pipeline_mode = #tpu.pipeline_mode<synchronous>, transform_indices = @transform_2, window_bounds = array<i64: 1, 128>}, {pipeline_mode = #tpu.pipeline_mode<synchronous>, transform_indices = @transform_3, window_bounds = array<i64: 128, 32>}, {pipeline_mode = #tpu.pipeline_mode<synchronous>, transform_indices = @transform_4, window_bounds = array<i64: 1, 32>}, {pipeline_mode = #tpu.pipeline_mode<synchronous>, transform_indices = @transform_5, window_bounds = array<i64: 32, 6>}, {pipeline_mode = #tpu.pipeline_mode<synchronous>, transform_indices = @transform_6, window_bounds = array<i64: 1, 6>}, {transform_indices = @transform_7, window_bounds = array<i64: 8, 6>}]} {
    %c0 = arith.constant 0 : index
    %c0_0 = arith.constant 0 : index
    %0 = vector.load %arg1[%c0, %c0_0] : memref<8x32xf32, #tpu.memory_space<vmem>>, vector<8x32xf32>
    %c0_1 = arith.constant 0 : index
    %c0_2 = arith.constant 0 : index
    %1 = vector.load %arg2[%c0_1, %c0_2] : memref<32x256xf32, #tpu.memory_space<vmem>>, vector<32x256xf32>
    %cst = arith.constant dense<0.000000e+00> : vector<8x256xf32>
    %2 = tpu.matmul %0, %1, %cst {dimension_numbers = #tpu.dot_dimension_numbers<[1], [0], [0], [1], [0, 0, 1, 1], [], []>} : vector<8x32xf32>, vector<32x256xf32>, vector<8x256xf32> -> vector<8x256xf32>
    %3 = vector.extract_strided_slice %2 {offsets = [0, 0], sizes = [8, 128], strides = [1, 1]} : vector<8x256xf32> to vector<8x128xf32>
    %4 = vector.extract_strided_slice %2 {offsets = [0, 128], sizes = [8, 128], strides = [1, 1]} : vector<8x256xf32> to vector<8x128xf32>
    %5 = arith.maximumf %3, %4 : vector<8x128xf32>
    %c0_3 = arith.constant 0 : index
    %c0_4 = arith.constant 0 : index
    %6 = vector.load %arg3[%c0_3, %c0_4] : memref<1x128xf32, #tpu.memory_space<vmem>>, vector<1x128xf32>
    %7 = vector.broadcast %6 : vector<1x128xf32> to vector<8x128xf32>
    %8 = arith.addf %5, %7 : vector<8x128xf32>
    %9 = math.tanh %8 : vector<8x128xf32>
    %c0_5 = arith.constant 0 : index
    %c0_6 = arith.constant 0 : index
    %10 = vector.load %arg4[%c0_5, %c0_6] : memref<128x32xf32, #tpu.memory_space<vmem>>, vector<128x32xf32>
    %cst_7 = arith.constant dense<0.000000e+00> : vector<8x32xf32>
    %11 = tpu.matmul %9, %10, %cst_7 {dimension_numbers = #tpu.dot_dimension_numbers<[1], [0], [0], [1], [0, 0, 1, 1], [], []>} : vector<8x128xf32>, vector<128x32xf32>, vector<8x32xf32> -> vector<8x32xf32>
    %c0_8 = arith.constant 0 : index
    %c0_9 = arith.constant 0 : index
    %12 = vector.load %arg5[%c0_8, %c0_9] : memref<1x32xf32, #tpu.memory_space<vmem>>, vector<1x32xf32>
    %13 = vector.broadcast %12 : vector<1x32xf32> to vector<8x32xf32>
    %14 = arith.addf %11, %13 : vector<8x32xf32>
    %15 = math.tanh %14 : vector<8x32xf32>
    %c0_10 = arith.constant 0 : index
    %c0_11 = arith.constant 0 : index
    %16 = vector.load %arg6[%c0_10, %c0_11] : memref<32x6xf32, #tpu.memory_space<vmem>>, vector<32x6xf32>
    %cst_12 = arith.constant dense<0.000000e+00> : vector<8x6xf32>
    %17 = tpu.matmul %15, %16, %cst_12 {dimension_numbers = #tpu.dot_dimension_numbers<[1], [0], [0], [1], [0, 0, 1, 1], [], []>} : vector<8x32xf32>, vector<32x6xf32>, vector<8x6xf32> -> vector<8x6xf32>
    %c0_13 = arith.constant 0 : index
    %c0_14 = arith.constant 0 : index
    %18 = vector.load %arg7[%c0_13, %c0_14] : memref<1x6xf32, #tpu.memory_space<vmem>>, vector<1x6xf32>
    %19 = vector.broadcast %18 : vector<1x6xf32> to vector<8x6xf32>
    %20 = arith.addf %17, %19 : vector<8x6xf32>
    %c0_15 = arith.constant 0 : index
    %c0_16 = arith.constant 0 : index
    %21 = vector.load %arg8[%c0_15, %c0_16] : memref<8x6xf32, #tpu.memory_space<vmem>>, vector<8x6xf32>
    tpu.vector_store %arg8[%c0_15, %c0_16], %20 {strides = array<i32>} : memref<8x6xf32, #tpu.memory_space<vmem>>, vector<8x6xf32>,
    return
  }
  func.func @transform_0(%arg0: i32) -> (i32, i32) {
    %c0_i32 = arith.constant 0 : i32
    %c0_i32_0 = arith.constant 0 : i32
    return %arg0, %c0_i32 : i32, i32
  }
  func.func @transform_1(%arg0: i32) -> (i32, i32) {
    %c0_i32 = arith.constant 0 : i32
    %c0_i32_0 = arith.constant 0 : i32
    %c0_i32_1 = arith.constant 0 : i32
    return %c0_i32, %c0_i32_0 : i32, i32
  }
  func.func @transform_2(%arg0: i32) -> (i32, i32) {
    %c0_i32 = arith.constant 0 : i32
    %c0_i32_0 = arith.constant 0 : i32
    %c0_i32_1 = arith.constant 0 : i32
    return %c0_i32, %c0_i32_0 : i32, i32
  }
  func.func @transform_3(%arg0: i32) -> (i32, i32) {
    %c0_i32 = arith.constant 0 : i32
    %c0_i32_0 = arith.constant 0 : i32
    %c0_i32_1 = arith.constant 0 : i32
    return %c0_i32, %c0_i32_0 : i32, i32
  }
  func.func @transform_4(%arg0: i32) -> (i32, i32) {
    %c0_i32 = arith.constant 0 : i32
    %c0_i32_0 = arith.constant 0 : i32
    %c0_i32_1 = arith.constant 0 : i32
    return %c0_i32, %c0_i32_0 : i32, i32
  }
  func.func @transform_5(%arg0: i32) -> (i32, i32) {
    %c0_i32 = arith.constant 0 : i32
    %c0_i32_0 = arith.constant 0 : i32
    %c0_i32_1 = arith.constant 0 : i32
    return %c0_i32, %c0_i32_0 : i32, i32
  }
  func.func @transform_6(%arg0: i32) -> (i32, i32) {
    %c0_i32 = arith.constant 0 : i32
    %c0_i32_0 = arith.constant 0 : i32
    %c0_i32_1 = arith.constant 0 : i32
    return %c0_i32, %c0_i32_0 : i32, i32
  }
  func.func @transform_7(%arg0: i32) -> (i32, i32) {
    %c0_i32 = arith.constant 0 : i32
    %c0_i32_0 = arith.constant 0 : i32
    return %arg0, %c0_i32 : i32, i32
  }
}

</mosaic_0001>

<bundles_post_ra>
// kernel: tpu_custom_call.1
= control target key start
LH: loop header
LB: loop body
LE: loop exit
PB: predicated region body
PF: predicated region fallthrough
CT: control target
= control target key end

     0   :  { %v417_v4 = vmov 0.0   ;;  %s584_s0 = inlined_call_operand.vmem [shape: f32[8,32], index: 0, kind: input, shape index: {}]   ;;  %s585_s1 = inlined_call_operand.vmem [shape: f32[32,256], index: 1, kind: input, shape index: {}]   ;;  %s586_s2 = inlined_call_operand.vmem [shape: f32[1,128], index: 2, kind: input, shape index: {}]   ;;  %s587_s3 = inlined_call_operand.vmem [shape: f32[128,32], index: 3, kind: input, shape index: {}]   ;;  %s588_s4 = inlined_call_operand.vmem [shape: f32[1,32], index: 4, kind: input, shape index: {}]   ;;  %s589_s5 = inlined_call_operand.vmem [shape: f32[32,6], index: 5, kind: input, shape index: {}]   ;;  %s590_s6 = inlined_call_operand.vmem [shape: f32[1,6], index: 6, kind: input, shape index: {}]   ;;  %s591_s7 = inlined_call_operand.hbm [shape: f32[8,6], index: 7, kind: output, shape index: {}]  }
   0x1   :  { %v35_v0 = vld [vmem:[%s585_s1 + $0x38] sm:$0xff]  ;;  %v34_v1 = vld [vmem:[%s585_s1 + $0x30] sm:$0xff]  ;;  %v33_v2 = vld [vmem:[%s585_s1 + $0x28] sm:$0xff]  ;;  %104 = vmatprep.mubr.f32.mxu0 %v417_v4  ;;  %342 = vmatprep.subr.mxu1 %v417_v4 }
   0x2   :  { %64 = vmatprep.subr.mxu0 %v35_v0  ;;  %v32_v3 = vld [vmem:[%s585_s1 + $0x20] sm:$0xff]  ;;  %v31_v5 = vld [vmem:[%s585_s1 + $0x18] sm:$0xff]  ;;  %v30_v6 = vld [vmem:[%s585_s1 + $0x10] sm:$0xff] }
   0x3   :  { %65 = vmatpush1.msra.mxu0 %v34_v1  ;;  %v136_v7 = vld [vmem:[%s587_s3 + $0x78] sm:$0xff]  ;;  %v135_v8 = vld [vmem:[%s587_s3 + $0x70] sm:$0xff]  ;;  %v29_v9 = vld [vmem:[%s585_s1 + $0x8] sm:$0xff] }
   0x4   :  { %66 = vmatprep.subr.mxu0 %v33_v2  ;;  %343 = vmatpush3.msra.mxu1 %v136_v7 }
   0x5   :  { %67 = vmatpush1.msra.mxu0 %v32_v3 }
   0x6   :  { %12 = vsyncpa [#allocation3], 0  ;;  %68 = vmatprep.subr.mxu0 %v31_v5  ;;  %v28_v10 = vld [vmem:[%s585_s1] sm:$0xff]  ;;  %344 = vmatprep.subr.mxu1 %v417_v4  ;;  %v134_v11 = vld [vmem:[%s587_s3 + $0x68] sm:$0xff]  ;;  %vm36_vm0 = vcmask 261120   ;;  %vm418_vm1 = vmmov 0  }
   0x7   :  { %69 = vmatpush1.msra.mxu0 %v30_v6  ;;  %v27_v12 = vld [vmem:[%s584_s0] sm:$0xff]  ;;  %345 = vmatpush3.msra.mxu1 %v135_v8  ;;  %v132_v14 = vld [vmem:[%s587_s3 + $0x58] sm:$0xff]  ;;  %v131_v15 = vld [vmem:[%s587_s3 + $0x50] sm:$0xff]  ;;  %vm299_vm2 = vcmask 48128  }
   0x8   :  { %70 = vmatprep.subr.mxu0 %v29_v9  ;;  %346 = vmatprep.subr.mxu1 %v417_v4  ;;  %v133_v13 = vld [vmem:[%s587_s3 + $0x60] sm:$0xff]  ;;  %v130_v16 = vld [vmem:[%s587_s3 + $0x48] sm:$0xff]  ;;  %v128_v18 = vld [vmem:[%s587_s3 + $0x38] sm:$0xff] }
   0x9   :  { %71 = vmatpush1.msra.mxu0 %v28_v10  ;;  %347 = vmatpush3.msra.mxu1 %v134_v11  ;;  %v129_v17 = vld [vmem:[%s587_s3 + $0x40] sm:$0xff]  ;;  %v127_v19 = vld [vmem:[%s587_s3 + $0x30] sm:$0xff]  ;;  %v126_v20 = vld [vmem:[%s587_s3 + $0x28] sm:$0xff] }
   0xa   :  { %315 = vmatmul.mubr.msk.f32.vlgmr.msra.gmra.mxu0 %vm36_vm0, %v27_v12  ;;  %348 = vmatprep.subr.mxu1 %v417_v4  ;;  %v125_v21 = vld [vmem:[%s587_s3 + $0x20] sm:$0xff]  ;;  %v124_v22 = vld [vmem:[%s587_s3 + $0x18] sm:$0xff]  ;;  %v123_v23 = vld [vmem:[%s587_s3 + $0x10] sm:$0xff] }
   0xb   :  { %349 = vmatpush3.msra.mxu1 %v133_v13  ;;  %377 = vmatprep.subr.mxu0 %v417_v4  ;;  %v122_v24 = vld [vmem:[%s587_s3 + $0x8] sm:$0xff]  ;;  %v121_v25 = vld [vmem:[%s587_s3] sm:$0xff]  ;;  %v218_v32 = vld [vmem:[%s589_s5 + $0x18] sm:$0xff] }
   0xc   :  { %350 = vmatprep.subr.mxu1 %v417_v4  ;;  %374 = vmatprep.mubr.msk.f32.mxu1 %vm418_vm1, %v417_v4  ;;  %v316_v28 = vld [vmem:[%s586_s2] ss:$0 sm:$0xff]  ;;  %v217_v33 = vld [vmem:[%s589_s5 + $0x10] sm:$0xff]  ;;  %v216_v34 = vld [vmem:[%s589_s5 + $0x8] sm:$0xff] }
   0xd   :  { %351 = vmatpush3.msra.mxu1 %v132_v14  ;;  %385 = vmatprep.mubr.msk.f32.mxu0 %vm418_vm1, %v417_v4  ;;  %v215_v35 = vld [vmem:[%s589_s5] sm:$0xff]  ;;  %s419_s5 = smov [#allocation2]  }
   0xe   :  { %352 = vmatprep.subr.mxu1 %v417_v4  ;;  %378 = vmatpush3.msra.mxu0 %v218_v32  ;;  %v317_v36 = vld [vmem:[%s588_s4] ss:$0 sm:$0xff]  ;;  %s307_s13 = sshll.u32 %s419_s5, 4  ;;  %s308_s13 = int_to_ptr.vmem [resolvable:$true] %s307_s13 }
   0xf   :  { %353 = vmatpush3.msra.mxu1 %v131_v15  ;;  %379 = vmatprep.subr.mxu0 %v417_v4  ;;  %v318_v41 = vld [vmem:[%s590_s6] ss:$0 sm:$0xff]  ;;  %s395_s4 = scalar_lea.vmem %s308_s13, 128  ;;  %p400_p1 = scmp.lt.s32.totalorder %s308_s13, %s308_s13 }
  0x10   :  { %354 = vmatprep.subr.mxu1 %v417_v4  ;;  %380 = vmatpush3.msra.mxu0 %v217_v33  ;;  %p396_p0 = scmp.ne.s32.totalorder %s308_s13, %s395_s4  ;;  %p401_p2 = scmp.lt.s32.totalorder %s395_s4, %s395_s4 }
  0x11   :  { %355 = vmatpush3.msra.mxu1 %v130_v16  ;;  %381 = vmatprep.subr.mxu0 %v417_v4 }
  0x12   :  { %356 = vmatprep.subr.mxu1 %v417_v4  ;;  %382 = vmatpush3.msra.mxu0 %v216_v34  ;;  %p402_p3 = por %p401_p2, %p400_p1 }
  0x13   :  { %357 = vmatpush3.msra.mxu1 %v129_v17  ;;  %383 = vmatprep.subr.mxu0 %v417_v4 }
  0x14   :  { %358 = vmatprep.subr.mxu1 %v417_v4  ;;  %384 = vmatpush3.msra.mxu0 %v215_v35  ;;  %p403_p4 = pnand %p402_p3, %p396_p0 }
  0x15   :  { %359 = vmatpush3.msra.mxu1 %v128_v18 }
  0x16   :  { %360 = vmatprep.subr.mxu1 %v417_v4 }
  0x17   :  { %361 = vmatpush3.msra.mxu1 %v127_v19 }
  0x18   :  { %362 = vmatprep.subr.mxu1 %v417_v4 }
  0x19   :  { %363 = vmatpush3.msra.mxu1 %v126_v20 }
  0x1a   :  { %364 = vmatprep.subr.mxu1 %v417_v4 }
  0x1b   :  { %365 = vmatpush3.msra.mxu1 %v125_v21 }
  0x1c   :  { %366 = vmatprep.subr.mxu1 %v417_v4 }
  0x1d   :  { %367 = vmatpush3.msra.mxu1 %v124_v22 }
  0x1e   :  { %368 = vmatprep.subr.mxu1 %v417_v4 }
  0x1f   :  { %369 = vmatpush3.msra.mxu1 %v123_v23 }
  0x20   :  { %370 = vmatprep.subr.mxu1 %v417_v4 }
  0x21   :  { %371 = vmatpush3.msra.mxu1 %v122_v24 }
  0x22   :  { %372 = vmatprep.subr.mxu1 %v417_v4 }
  0x23   :  { %373 = vmatpush3.msra.mxu1 %v121_v25 }
  0xca   :  { %v106_v26 = vpop.f32.mrf.mxu0 }
  0xcc   :  { %v108_v27 = vpop.f32.mrf.mxu0 }
  0xcd   :  { %v111_v29 = vmax.f32 %v106_v26, %v108_v27 }
  0xcf   :  { %v119_v30 = vadd.f32 %v316_v28, %v111_v29 }
  0xd1   :  { %391 = vtanh.f32 %v119_v30 }
  0xde   :  { %v392_v31 = vpop.eup %391 }
  0xdf   :  { %375 = vmatmul.mubr.f32.vlgmr.msra.gmra.mxu1 %v392_v31 }
 0x19f   :  { %v210_v37 = vpop.f32.mrf.mxu1 }
 0x1a0   :  { %v211_v38 = vadd.f32 %v317_v36, %v210_v37 }
 0x1a1   :  { %v376_v39 = vpop.f32.mrf.mxu1 }
 0x1a2   :  { %393 = vtanh.f32 %v211_v38 }
 0x1af   :  { %v394_v40 = vpop.eup %393 }
 0x1b0   :  { %386 = vmatmul.mubr.msk.f32.vlgmr.msra.gmra.mxu0 %vm36_vm0, %v394_v40 }
 0x270   :  { %v295_v42 = vpop.f32.mrf.mxu0 }
 0x271   :  { %v296_v43 = vadd.f32 %v318_v41, %v295_v42 }
 0x272   :  { %v387_v44 = vpop.f32.mrf.mxu0 }
 0x273   :  { %300 = vst.msk [vmem:[#allocation2] sm:$0xff] %vm299_vm2, %v296_v43 }
 0x274   :  { %406 = shalt.err (!%p403_p4)
}
 0x275   :  { %310 = dma.vmem_to_hbm [thread:$0]  %s308_s13, 128, %s591_s7, [#allocation3]  }
 0x276   :  { %415 = dma.done.wait [#allocation3], 128  }
 0x277   :  { %416 = vsyncadd [#allocation3], 4294967168 }
 0x278   :  { %314 = vsyncpa [#allocation3], 1 }

</bundles_post_ra>
